<compile_context>
chip_gen: v5e
topology: v5e:2x2
jax: 0.10.0
libtpu: 0.0.40
codegen_flags: <defaults>
</compile_context>

<pallas_src>
import functools
import math

import jax
import jax.numpy as jnp
from jax import lax
from jax.experimental import pallas as pl
from jax.experimental.pallas import tpu as pltpu

_NEG_BIG = -1.0e30   # finite "minus infinity" for masked entries of -C/eps


def _sinkhorn_kernel(xt_ref, yt_ref,                     # inputs  (N,D,P1p), (N,D,P2p)
                     cost_ref, pi_ref, c_hbm_ref,        # outputs (N,1), (N,P1p,P2p), ANY
                     c_vmem, negcs_vmem, ut_ref, vt_ref,  # scratch
                     err_vmem, err_smem, c_copy_sem,
                     *, eps, max_iter, thresh, p1, p2, use_mxu):
    n, d, p1p = xt_ref.shape
    _, _, p2p = yt_ref.shape
    inv_eps = 1.0 / eps

    # ---- validity masks for the padded rows (i >= p1) / cols (j >= p2) ------
    row_ids = lax.broadcasted_iota(jnp.int32, (p1p, p2p), 0)
    col_ids = lax.broadcasted_iota(jnp.int32, (p1p, p2p), 1)
    valid2d = (row_ids < p1) & (col_ids < p2)             # (P1p, P2p)

    # ---- cost matrix C[i,j] = sum_d (x_id - y_jd)^2 --------------------------
    if use_mxu:
        # Batched MXU route (one dispatch for the whole batch), f32 + HIGHEST
        # because eps amplifies C error 1/eps-fold inside exp().
        xt = xt_ref[...]                                   # (N, D, P1p)
        yt = yt_ref[...]                                   # (N, D, P2p)
        xy = lax.dot_general(xt, yt, (((1,), (1,)), ((0,), (0,))),
                             preferred_element_type=jnp.float32,
                             precision=lax.Precision.HIGHEST)   # (N, P1p, P2p)
        x2 = jnp.sum(xt * xt, axis=1)                      # (N, P1p)
        y2 = jnp.sum(yt * yt, axis=1)                      # (N, P2p)
        c = jnp.maximum(x2[:, :, None] + y2[:, None, :] - 2.0 * xy, 0.0)
    else:
        # Small D: exact VPU accumulation (no cancellation), D unrolls at trace.
        xt = xt_ref[...]
        yt = yt_ref[...]
        c = jnp.zeros((n, p1p, p2p), jnp.float32)
        for di in range(d):
            xd = xt[:, di, :]                              # (N, P1p)
            yd = yt[:, di, :]                              # (N, P2p)
            diff = xd[:, :, None] - yd[:, None, :]
            c = c + diff * diff

    c_vmem[...] = jnp.where(valid2d[None], c, 0.0)
    negcs_vmem[...] = jnp.where(valid2d[None], c * (-inv_eps), _NEG_BIG)

    # C writeback overlaps the whole Sinkhorn loop (output lives in ANY/HBM).
    c_copy = pltpu.make_async_copy(c_vmem, c_hbm_ref, c_copy_sem.at[0])
    c_copy.start()

    # mu = 1/P1, nu = 1/P2 -> log-marginals are compile-time constants.
    log_mu = math.log(1.0 / p1 + 1e-8)
    log_nu = math.log(1.0 / p2 + 1e-8)

    ut_ref[...] = jnp.zeros_like(ut_ref)     # ut = u / eps
    vt_ref[...] = jnp.zeros_like(vt_ref)     # vt = v / eps
    err_smem[0] = jnp.float32(1.0e30)

    def iter_body(_, carry):
        # PyTorch checks err after both updates of an iteration and then breaks;
        # gating the *next* iteration on the previous err applies exactly the
        # same set of updates.  The gate is a single SMEM scalar load per trip.
        @pl.when(err_smem[0] >= thresh)
        def _():
            row_mask = lax.broadcasted_iota(jnp.int32, (1, p1p), 1) < p1
            col_mask = lax.broadcasted_iota(jnp.int32, (1, p2p), 1) < p2

            ut = ut_ref[...]                               # (N, P1p)
            vt = vt_ref[...]                               # (N, P2p)
            m = negcs_vmem[...] + ut[:, :, None] + vt[:, None, :]   # (N,P1p,P2p)

            # u-step: row logsumexp (max-shifted, exact).
            rowmax = jnp.max(m, axis=-1)                   # (N, P1p)
            e1 = jnp.exp(m - rowmax[:, :, None])
            l1 = rowmax + jnp.log(jnp.sum(e1, axis=-1))
            ut_new = jnp.where(row_mask, (log_mu - l1) + ut, 0.0)
            du = ut_new - ut                               # 0 on padded rows

            # v-step: reuse M incrementally; column logsumexp (max-shifted).
            m2 = m + du[:, :, None]
            colmax = jnp.max(m2, axis=-2)                  # (N, P2p)
            e2 = jnp.exp(m2 - colmax[:, None, :])
            l2 = colmax + jnp.log(jnp.sum(e2, axis=-2))
            vt_new = jnp.where(col_mask, (log_nu - l2) + vt, 0.0)

            ut_ref[...] = ut_new
            vt_ref[...] = vt_new

            # err = mean_n sum_i |u_new - u|   (batch-coupled, as in PyTorch)
            per_n = jnp.sum(jnp.abs(du), axis=-1, keepdims=True)          # (N,1)
            err_vmem[...] = eps * jnp.mean(per_n, axis=0, keepdims=True)  # (1,1)
            err_smem[0] = err_vmem[0, 0]                   # scalar mirror for gate
        return carry

    lax.fori_loop(0, max_iter, iter_body, 0)

    # ---- transport plan and OT cost ------------------------------------------
    ut = ut_ref[...]
    vt = vt_ref[...]
    pi = jnp.exp(negcs_vmem[...] + ut[:, :, None] + vt[:, None, :])   # padded -> 0
    pi_ref[...] = pi
    cost = jnp.sum(jnp.sum(pi * c_vmem[...], axis=-1), axis=-1)       # (N,)
    cost_ref[...] = cost[:, None]

    c_copy.wait()


def _pick_vmem_limit(working_set_bytes):
    """Scoped-VMEM limit sized from the actual part instead of a fixed 32 MiB."""
    try:
        cap = int(pltpu.get_tpu_info().vmem_capacity_bytes)
    except Exception:
        cap = 64 * 1024 * 1024                  # v7x physical size (smallest)
    want = max(32 * 1024 * 1024, int(1.5 * working_set_bytes))
    return int(min(want, int(0.75 * cap)))      # leave headroom for the compiler


def sinkhorn_distance(x, y, eps=0.01, max_iter=100, reduction="none", thresh=0.1):
    """Equivalent of SinkhornDistance(eps, max_iter, reduction)(x, y)."""
    x = jnp.asarray(x, jnp.float32)
    y = jnp.asarray(y, jnp.float32)
    squeeze = (x.ndim == 2)          # the PyTorch module also accepts unbatched 2-D
    if squeeze:
        x = x[None]
        y = y[None]
    n, p1, d = x.shape
    _, p2, _ = y.shape

    # Lane-dense padding: P2 (lane axis of all (P1,P2) matrices) -> multiple of
    # 128, P1 (sublane axis) -> multiple of 8.  Masked inside the kernel.
    p1p = ((p1 + 7) // 8) * 8
    p2p = ((p2 + 127) // 128) * 128

    # Feature-major layout so the cost build reads lane-dense (N, P) slices.
    xt = jnp.pad(jnp.swapaxes(x, 1, 2), ((0, 0), (0, 0), (0, p1p - p1)))   # (N,D,P1p)
    yt = jnp.pad(jnp.swapaxes(y, 1, 2), ((0, 0), (0, 0), (0, p2p - p2)))   # (N,D,P2p)

    use_mxu = d > 8     # small D: exact VPU accumulation; large D: batched MXU

    kernel = functools.partial(
        _sinkhorn_kernel, eps=float(eps), max_iter=int(max_iter),
        thresh=float(thresh), p1=p1, p2=p2, use_mxu=use_mxu)

    slab = n * p1p * p2p * 4
    # resident: pi output (pipeline-buffered) + C + negCs scratch + M/E temporaries
    vmem_limit = _pick_vmem_limit(8 * slab + 2 * 1024 * 1024)

    # TODO(synk): on v7x the second TensorCore stays idle; splitting P1 rows
    # across cores needs a cross-core combine for the column-LSE and the
    # batch-coupled err, which would change the faithful single-stream loop.
    cost2d, pi_pad, c_pad = pl.pallas_call(
        kernel,
        grid=(1,),
        in_specs=[
            pl.BlockSpec((n, d, p1p), lambda i: (0, 0, 0)),
            pl.BlockSpec((n, d, p2p), lambda i: (0, 0, 0)),
        ],
        out_specs=(
            pl.BlockSpec((n, 1), lambda i: (0, 0)),
            pl.BlockSpec((n, p1p, p2p), lambda i: (0, 0, 0)),
            pl.BlockSpec(memory_space=pl.ANY),      # C: manual async writeback
        ),
        out_shape=(
            jax.ShapeDtypeStruct((n, 1), jnp.float32),
            jax.ShapeDtypeStruct((n, p1p, p2p), jnp.float32),
            jax.ShapeDtypeStruct((n, p1p, p2p), jnp.float32),
        ),
        scratch_shapes=[
            pltpu.VMEM((n, p1p, p2p), jnp.float32),   # C (masked to 0 on padding)
            pltpu.VMEM((n, p1p, p2p), jnp.float32),   # -C/eps (masked to -1e30)
            pltpu.VMEM((n, p1p), jnp.float32),        # ut = u / eps
            pltpu.VMEM((n, p2p), jnp.float32),        # vt = v / eps
            pltpu.VMEM((1, 1), jnp.float32),          # batch-mean error (vector form)
            pltpu.SMEM((1,), jnp.float32),            # error mirror for scalar gate
            pltpu.SemaphoreType.DMA((1,)),            # C writeback semaphore
        ],
        compiler_params=pltpu.CompilerParams(
            dimension_semantics=("arbitrary",),
            vmem_limit_bytes=vmem_limit,
        ),
    )(xt, yt)

    cost = cost2d[:, 0]                     # (N,), matches reduction='none'
    pi = pi_pad[:, :p1, :p2]
    c_out = c_pad[:, :p1, :p2]
    if squeeze:
        cost, pi, c_out = cost[0], pi[0], c_out[0]
    if reduction == "mean":
        cost = cost.mean()
    elif reduction == "sum":
        cost = cost.sum()
    return cost, pi, c_out


if __name__ == "__main__":
    key = jax.random.PRNGKey(0)
    kx, ky = jax.random.split(key)
    # x: (N, P1, D), y: (N, P2, D)
    x = jax.random.normal(kx, (2, 8, 4), dtype=jnp.float32)
    y = jax.random.normal(ky, (2, 16, 4), dtype=jnp.float32)

    cost, pi, C = sinkhorn_distance(x, y, eps=0.01, max_iter=100, reduction="none")
    jax.block_until_ready((cost, pi, C))
    print("KERNEL_OK")
</pallas_src>

<mosaic_0001>
module attributes {stable_mosaic.version = 11 : i64} {
  func.func @_sinkhorn_kernel(%arg0: i32, %arg1: memref<2x4x8xf32, #tpu.memory_space<vmem>>, %arg2: memref<2x4x128xf32, #tpu.memory_space<vmem>>, %arg3: memref<2x1xf32, #tpu.memory_space<vmem>>, %arg4: memref<2x8x128xf32, #tpu.memory_space<vmem>>, %arg5: memref<2x8x128xf32, #tpu.memory_space<any>>, %arg6: memref<2x8x128xf32, #tpu.memory_space<vmem>>, %arg7: memref<2x8x128xf32, #tpu.memory_space<vmem>>, %arg8: memref<2x8xf32, #tpu.memory_space<vmem>>, %arg9: memref<2x128xf32, #tpu.memory_space<vmem>>, %arg10: memref<1x1xf32, #tpu.memory_space<vmem>>, %arg11: memref<1xf32, #tpu.memory_space<smem>>, %arg12: memref<1x!tpu.dma_semaphore, #tpu.memory_space<semaphore_mem>>) attributes {dimension_semantics = [#tpu.dimension_semantics<arbitrary>], iteration_bounds = array<i64: 1>, scalar_prefetch = 0 : i64, scratch_operands = 7 : i64, tpu.core_type = #tpu.core_type<tc>, window_params = [{pipeline_mode = #tpu.pipeline_mode<synchronous>, transform_indices = @transform_0, window_bounds = array<i64: 2, 4, 8>}, {pipeline_mode = #tpu.pipeline_mode<synchronous>, transform_indices = @transform_1, window_bounds = array<i64: 2, 4, 128>}, {pipeline_mode = #tpu.pipeline_mode<synchronous>, transform_indices = @transform_2, window_bounds = array<i64: 2, 1>}, {pipeline_mode = #tpu.pipeline_mode<synchronous>, transform_indices = @transform_3, window_bounds = array<i64: 2, 8, 128>}, {}]} {
    %0 = tpu.iota {dimensions = array<i32: 0>} : vector<8x128xi32>
    %1 = tpu.iota {dimensions = array<i32: 1>} : vector<8x128xi32>
    %c8_i32 = arith.constant 8 : i32
    %2 = vector.broadcast %c8_i32 : i32 to vector<8x128xi32>
    %3 = arith.cmpi slt, %0, %2 : vector<8x128xi32>
    %c16_i32 = arith.constant 16 : i32
    %4 = vector.broadcast %c16_i32 : i32 to vector<8x128xi32>
    %5 = arith.cmpi slt, %1, %4 : vector<8x128xi32>
    %6 = arith.andi %3, %5 : vector<8x128xi1>
    %c0 = arith.constant 0 : index
    %c0_0 = arith.constant 0 : index
    %c0_1 = arith.constant 0 : index
    %7 = vector.load %arg1[%c0, %c0_0, %c0_1] : memref<2x4x8xf32, #tpu.memory_space<vmem>>, vector<2x4x8xf32>
    %c0_2 = arith.constant 0 : index
    %c0_3 = arith.constant 0 : index
    %c0_4 = arith.constant 0 : index
    %8 = vector.load %arg2[%c0_2, %c0_3, %c0_4] : memref<2x4x128xf32, #tpu.memory_space<vmem>>, vector<2x4x128xf32>
    %cst = arith.constant 0.000000e+00 : f32
    %9 = vector.broadcast %cst : f32 to vector<2x8x128xf32>
    %10 = vector.extract_strided_slice %7 {offsets = [0, 0, 0], sizes = [2, 1, 8], strides = [1, 1, 1]} : vector<2x4x8xf32> to vector<2x1x8xf32>
    %11 = vector.shape_cast %10 : vector<2x1x8xf32> to vector<2x8xf32>
    %12 = vector.extract_strided_slice %8 {offsets = [0, 0, 0], sizes = [2, 1, 128], strides = [1, 1, 1]} : vector<2x4x128xf32> to vector<2x1x128xf32>
    %13 = vector.shape_cast %12 : vector<2x1x128xf32> to vector<2x128xf32>
    %14 = vector.shape_cast %11 : vector<2x8xf32> to vector<2x8x1xf32>
    %15 = vector.shape_cast %13 : vector<2x128xf32> to vector<2x1x128xf32>
    %16 = vector.broadcast %14 : vector<2x8x1xf32> to vector<2x8x128xf32>
    %17 = vector.broadcast %15 : vector<2x1x128xf32> to vector<2x8x128xf32>
    %18 = arith.subf %16, %17 : vector<2x8x128xf32>
    %19 = arith.mulf %18, %18 : vector<2x8x128xf32>
    %20 = arith.addf %9, %19 : vector<2x8x128xf32>
    %21 = vector.extract_strided_slice %7 {offsets = [0, 1, 0], sizes = [2, 1, 8], strides = [1, 1, 1]} : vector<2x4x8xf32> to vector<2x1x8xf32>
    %22 = vector.shape_cast %21 : vector<2x1x8xf32> to vector<2x8xf32>
    %23 = vector.extract_strided_slice %8 {offsets = [0, 1, 0], sizes = [2, 1, 128], strides = [1, 1, 1]} : vector<2x4x128xf32> to vector<2x1x128xf32>
    %24 = vector.shape_cast %23 : vector<2x1x128xf32> to vector<2x128xf32>
    %25 = vector.shape_cast %22 : vector<2x8xf32> to vector<2x8x1xf32>
    %26 = vector.shape_cast %24 : vector<2x128xf32> to vector<2x1x128xf32>
    %27 = vector.broadcast %25 : vector<2x8x1xf32> to vector<2x8x128xf32>
    %28 = vector.broadcast %26 : vector<2x1x128xf32> to vector<2x8x128xf32>
    %29 = arith.subf %27, %28 : vector<2x8x128xf32>
    %30 = arith.mulf %29, %29 : vector<2x8x128xf32>
    %31 = arith.addf %20, %30 : vector<2x8x128xf32>
    %32 = vector.extract_strided_slice %7 {offsets = [0, 2, 0], sizes = [2, 1, 8], strides = [1, 1, 1]} : vector<2x4x8xf32> to vector<2x1x8xf32>
    %33 = vector.shape_cast %32 : vector<2x1x8xf32> to vector<2x8xf32>
    %34 = vector.extract_strided_slice %8 {offsets = [0, 2, 0], sizes = [2, 1, 128], strides = [1, 1, 1]} : vector<2x4x128xf32> to vector<2x1x128xf32>
    %35 = vector.shape_cast %34 : vector<2x1x128xf32> to vector<2x128xf32>
    %36 = vector.shape_cast %33 : vector<2x8xf32> to vector<2x8x1xf32>
    %37 = vector.shape_cast %35 : vector<2x128xf32> to vector<2x1x128xf32>
    %38 = vector.broadcast %36 : vector<2x8x1xf32> to vector<2x8x128xf32>
    %39 = vector.broadcast %37 : vector<2x1x128xf32> to vector<2x8x128xf32>
    %40 = arith.subf %38, %39 : vector<2x8x128xf32>
    %41 = arith.mulf %40, %40 : vector<2x8x128xf32>
    %42 = arith.addf %31, %41 : vector<2x8x128xf32>
    %43 = vector.extract_strided_slice %7 {offsets = [0, 3, 0], sizes = [2, 1, 8], strides = [1, 1, 1]} : vector<2x4x8xf32> to vector<2x1x8xf32>
    %44 = vector.shape_cast %43 : vector<2x1x8xf32> to vector<2x8xf32>
    %45 = vector.extract_strided_slice %8 {offsets = [0, 3, 0], sizes = [2, 1, 128], strides = [1, 1, 1]} : vector<2x4x128xf32> to vector<2x1x128xf32>
    %46 = vector.shape_cast %45 : vector<2x1x128xf32> to vector<2x128xf32>
    %47 = vector.shape_cast %44 : vector<2x8xf32> to vector<2x8x1xf32>
    %48 = vector.shape_cast %46 : vector<2x128xf32> to vector<2x1x128xf32>
    %49 = vector.broadcast %47 : vector<2x8x1xf32> to vector<2x8x128xf32>
    %50 = vector.broadcast %48 : vector<2x1x128xf32> to vector<2x8x128xf32>
    %51 = arith.subf %49, %50 : vector<2x8x128xf32>
    %52 = arith.mulf %51, %51 : vector<2x8x128xf32>
    %53 = arith.addf %42, %52 : vector<2x8x128xf32>
    %54 = vector.shape_cast %6 : vector<8x128xi1> to vector<1x8x128xi1>
    %cst_5 = arith.constant 0.000000e+00 : f32
    %55 = vector.shape_cast %54 : vector<1x8x128xi1> to vector<1x8x128xi1>
    %56 = vector.broadcast %55 : vector<1x8x128xi1> to vector<2x8x128xi1>
    %57 = vector.broadcast %cst_5 : f32 to vector<2x8x128xf32>
    %58 = arith.select %56, %53, %57 : vector<2x8x128xi1>, vector<2x8x128xf32>
    %c0_6 = arith.constant 0 : index
    %c0_7 = arith.constant 0 : index
    %c0_8 = arith.constant 0 : index
    %59 = vector.load %arg6[%c0_6, %c0_7, %c0_8] : memref<2x8x128xf32, #tpu.memory_space<vmem>>, vector<2x8x128xf32>
    tpu.vector_store %arg6[%c0_6, %c0_7, %c0_8], %58 {strides = array<i32>} : memref<2x8x128xf32, #tpu.memory_space<vmem>>, vector<2x8x128xf32>,
    %60 = vector.shape_cast %6 : vector<8x128xi1> to vector<1x8x128xi1>
    %cst_9 = arith.constant -1.000000e+02 : f32
    %61 = vector.broadcast %cst_9 : f32 to vector<2x8x128xf32>
    %62 = arith.mulf %53, %61 : vector<2x8x128xf32>
    %cst_10 = arith.constant -1.000000e+30 : f32
    %63 = vector.shape_cast %60 : vector<1x8x128xi1> to vector<1x8x128xi1>
    %64 = vector.broadcast %63 : vector<1x8x128xi1> to vector<2x8x128xi1>
    %65 = vector.broadcast %cst_10 : f32 to vector<2x8x128xf32>
    %66 = arith.select %64, %62, %65 : vector<2x8x128xi1>, vector<2x8x128xf32>
    %c0_11 = arith.constant 0 : index
    %c0_12 = arith.constant 0 : index
    %c0_13 = arith.constant 0 : index
    %67 = vector.load %arg7[%c0_11, %c0_12, %c0_13] : memref<2x8x128xf32, #tpu.memory_space<vmem>>, vector<2x8x128xf32>
    tpu.vector_store %arg7[%c0_11, %c0_12, %c0_13], %66 {strides = array<i32>} : memref<2x8x128xf32, #tpu.memory_space<vmem>>, vector<2x8x128xf32>,
    %c0_i32 = arith.constant 0 : i32
    %68 = tpu.memref_slice %arg12[%c0_i32] : memref<1x!tpu.dma_semaphore, #tpu.memory_space<semaphore_mem>> -> memref<1x!tpu.dma_semaphore, #tpu.memory_space<semaphore_mem>>
    %69 = tpu.memref_squeeze %68 : memref<1x!tpu.dma_semaphore, #tpu.memory_space<semaphore_mem>> -> memref<!tpu.dma_semaphore, #tpu.memory_space<semaphore_mem>>
    tpu.enqueue_dma source(%arg6 : memref<2x8x128xf32, #tpu.memory_space<vmem>>) target(%arg5 : memref<2x8x128xf32, #tpu.memory_space<any>>) target_semaphore(%69 : memref<!tpu.dma_semaphore, #tpu.memory_space<semaphore_mem>>)
    %cst_14 = arith.constant 0.000000e+00 : f32
    %70 = vector.broadcast %cst_14 : f32 to vector<2x8xf32>
    %c0_15 = arith.constant 0 : index
    %c0_16 = arith.constant 0 : index
    %71 = vector.load %arg8[%c0_15, %c0_16] : memref<2x8xf32, #tpu.memory_space<vmem>>, vector<2x8xf32>
    tpu.vector_store %arg8[%c0_15, %c0_16], %70 {strides = array<i32>} : memref<2x8xf32, #tpu.memory_space<vmem>>, vector<2x8xf32>,
    %cst_17 = arith.constant 0.000000e+00 : f32
    %72 = vector.broadcast %cst_17 : f32 to vector<2x128xf32>
    %c0_18 = arith.constant 0 : index
    %c0_19 = arith.constant 0 : index
    %73 = vector.load %arg9[%c0_18, %c0_19] : memref<2x128xf32, #tpu.memory_space<vmem>>, vector<2x128xf32>
    tpu.vector_store %arg9[%c0_18, %c0_19], %72 {strides = array<i32>} : memref<2x128xf32, #tpu.memory_space<vmem>>, vector<2x128xf32>,
    %cst_20 = arith.constant 1.000000e+30 : f32
    %c0_21 = arith.constant 0 : index
    %74 = memref.load %arg11[%c0_21] : memref<1xf32, #tpu.memory_space<smem>>
    memref.store %cst_20, %arg11[%c0_21] : memref<1xf32, #tpu.memory_space<smem>>
    %c0_i32_22 = arith.constant 0 : i32
    %c100_i32 = arith.constant 100 : i32
    %75 = arith.addi %c0_i32_22, %c100_i32 : i32
    %c1_i32 = arith.constant 1 : i32
    scf.for %arg13 = %c0_i32_22 to %75 step %c1_i32  : i32 {
      %c0_41 = arith.constant 0 : index
      %95 = memref.load %arg11[%c0_41] : memref<1xf32, #tpu.memory_space<smem>>
      %cst_42 = arith.constant 1.000000e-01 : f32
      %96 = arith.cmpf oge, %95, %cst_42 : f32
      %97 = arith.extui %96 : i1 to i32
      %c0_i32_43 = arith.constant 0 : i32
      %98 = arith.cmpi ne, %97, %c0_i32_43 : i32
      scf.if %98 {
        %99 = tpu.iota {dimensions = array<i32: 1>} : vector<1x8xi32>
        %c8_i32_44 = arith.constant 8 : i32
        %100 = vector.broadcast %c8_i32_44 : i32 to vector<1x8xi32>
        %101 = arith.cmpi slt, %99, %100 : vector<1x8xi32>
        %102 = tpu.iota {dimensions = array<i32: 1>} : vector<1x128xi32>
        %c16_i32_45 = arith.constant 16 : i32
        %103 = vector.broadcast %c16_i32_45 : i32 to vector<1x128xi32>
        %104 = arith.cmpi slt, %102, %103 : vector<1x128xi32>
        %c0_46 = arith.constant 0 : index
        %c0_47 = arith.constant 0 : index
        %105 = vector.load %arg8[%c0_46, %c0_47] : memref<2x8xf32, #tpu.memory_space<vmem>>, vector<2x8xf32>
        %c0_48 = arith.constant 0 : index
        %c0_49 = arith.constant 0 : index
        %106 = vector.load %arg9[%c0_48, %c0_49] : memref<2x128xf32, #tpu.memory_space<vmem>>, vector<2x128xf32>
        %c0_50 = arith.constant 0 : index
        %c0_51 = arith.constant 0 : index
        %c0_52 = arith.constant 0 : index
        %107 = vector.load %arg7[%c0_50, %c0_51, %c0_52] : memref<2x8x128xf32, #tpu.memory_space<vmem>>, vector<2x8x128xf32>
        %108 = vector.shape_cast %105 : vector<2x8xf32> to vector<2x8x1xf32>
        %109 = vector.broadcast %108 : vector<2x8x1xf32> to vector<2x8x128xf32>
        %110 = arith.addf %107, %109 : vector<2x8x128xf32>
        %111 = vector.shape_cast %106 : vector<2x128xf32> to vector<2x1x128xf32>
        %112 = vector.broadcast %111 : vector<2x1x128xf32> to vector<2x8x128xf32>
        %113 = arith.addf %110, %112 : vector<2x8x128xf32>
        %cst_53 = arith.constant dense<0xFF800000> : vector<2x8xf32>
        %114 = vector.multi_reduction <maximumf>, %113, %cst_53 [2] : vector<2x8x128xf32> to vector<2x8xf32>
        %115 = vector.shape_cast %114 : vector<2x8xf32> to vector<2x8x1xf32>
        %116 = vector.broadcast %115 : vector<2x8x1xf32> to vector<2x8x128xf32>
        %117 = arith.subf %113, %116 : vector<2x8x128xf32>
        %118 = math.exp %117 : vector<2x8x128xf32>
        %cst_54 = arith.constant dense<0.000000e+00> : vector<2x8xf32>
        %119 = vector.multi_reduction <add>, %118, %cst_54 [2] : vector<2x8x128xf32> to vector<2x8xf32>
        %120 = math.log %119 : vector<2x8xf32>
        %121 = arith.addf %114, %120 : vector<2x8xf32>
        %cst_55 = arith.constant -2.07944155 : f32
        %122 = vector.broadcast %cst_55 : f32 to vector<2x8xf32>
        %123 = arith.subf %122, %121 : vector<2x8xf32>
        %124 = arith.addf %123, %105 : vector<2x8xf32>
        %cst_56 = arith.constant 0.000000e+00 : f32
        %125 = vector.shape_cast %101 : vector<1x8xi1> to vector<1x8xi1>
        %126 = vector.broadcast %125 : vector<1x8xi1> to vector<2x8xi1>
        %127 = vector.broadcast %cst_56 : f32 to vector<2x8xf32>
        %128 = arith.select %126, %124, %127 : vector<2x8xi1>, vector<2x8xf32>
        %129 = arith.subf %128, %105 : vector<2x8xf32>
        %130 = vector.shape_cast %129 : vector<2x8xf32> to vector<2x8x1xf32>
        %131 = vector.broadcast %130 : vector<2x8x1xf32> to vector<2x8x128xf32>
        %132 = arith.addf %113, %131 : vector<2x8x128xf32>
        %cst_57 = arith.constant dense<0xFF800000> : vector<2x128xf32>
        %133 = vector.multi_reduction <maximumf>, %132, %cst_57 [1] : vector<2x8x128xf32> to vector<2x128xf32>
        %134 = vector.shape_cast %133 : vector<2x128xf32> to vector<2x1x128xf32>
        %135 = vector.broadcast %134 : vector<2x1x128xf32> to vector<2x8x128xf32>
        %136 = arith.subf %132, %135 : vector<2x8x128xf32>
        %137 = math.exp %136 : vector<2x8x128xf32>
        %cst_58 = arith.constant dense<0.000000e+00> : vector<2x128xf32>
        %138 = vector.multi_reduction <add>, %137, %cst_58 [1] : vector<2x8x128xf32> to vector<2x128xf32>
        %139 = math.log %138 : vector<2x128xf32>
        %140 = arith.addf %133, %139 : vector<2x128xf32>
        %cst_59 = arith.constant -2.77258849 : f32
        %141 = vector.broadcast %cst_59 : f32 to vector<2x128xf32>
        %142 = arith.subf %141, %140 : vector<2x128xf32>
        %143 = arith.addf %142, %106 : vector<2x128xf32>
        %cst_60 = arith.constant 0.000000e+00 : f32
        %144 = vector.shape_cast %104 : vector<1x128xi1> to vector<1x128xi1>
        %145 = vector.broadcast %144 : vector<1x128xi1> to vector<2x128xi1>
        %146 = vector.broadcast %cst_60 : f32 to vector<2x128xf32>
        %147 = arith.select %145, %143, %146 : vector<2x128xi1>, vector<2x128xf32>
        %c0_61 = arith.constant 0 : index
        %c0_62 = arith.constant 0 : index
        %148 = vector.load %arg8[%c0_61, %c0_62] : memref<2x8xf32, #tpu.memory_space<vmem>>, vector<2x8xf32>
        tpu.vector_store %arg8[%c0_61, %c0_62], %128 {strides = array<i32>} : memref<2x8xf32, #tpu.memory_space<vmem>>, vector<2x8xf32>,
        %c0_63 = arith.constant 0 : index
        %c0_64 = arith.constant 0 : index
        %149 = vector.load %arg9[%c0_63, %c0_64] : memref<2x128xf32, #tpu.memory_space<vmem>>, vector<2x128xf32>
        tpu.vector_store %arg9[%c0_63, %c0_64], %147 {strides = array<i32>} : memref<2x128xf32, #tpu.memory_space<vmem>>, vector<2x128xf32>,
        %150 = math.absf %129 : vector<2x8xf32>
        %cst_65 = arith.constant dense<0.000000e+00> : vector<2xf32>
        %151 = vector.multi_reduction <add>, %150, %cst_65 [1] : vector<2x8xf32> to vector<2xf32>
        %152 = vector.shape_cast %151 : vector<2xf32> to vector<2x1xf32>
        %cst_66 = arith.constant dense<0.000000e+00> : vector<1xf32>
        %153 = vector.multi_reduction <add>, %152, %cst_66 [0] : vector<2x1xf32> to vector<1xf32>
        %154 = vector.shape_cast %153 : vector<1xf32> to vector<1x1xf32>
        %cst_67 = arith.constant 2.000000e+00 : f32
        %155 = vector.broadcast %cst_67 : f32 to vector<1x1xf32>
        %156 = arith.divf %154, %155 : vector<1x1xf32>
        %cst_68 = arith.constant 0.00999999977 : f32
        %157 = vector.broadcast %cst_68 : f32 to vector<1x1xf32>
        %158 = arith.mulf %157, %156 : vector<1x1xf32>
        %c0_69 = arith.constant 0 : index
        %c0_70 = arith.constant 0 : index
        %159 = vector.load %arg10[%c0_69, %c0_70] : memref<1x1xf32, #tpu.memory_space<vmem>>, vector<1x1xf32>
        tpu.vector_store %arg10[%c0_69, %c0_70], %158 {strides = array<i32>} : memref<1x1xf32, #tpu.memory_space<vmem>>, vector<1x1xf32>,
        %c0_71 = arith.constant 0 : index
        %c0_72 = arith.constant 0 : index
        %160 = vector.load %arg10[%c0_71, %c0_72] : memref<1x1xf32, #tpu.memory_space<vmem>>, vector<1x1xf32>
        %161 = vector.extract %160[0, 0] : f32 from vector<1x1xf32>
        %c0_73 = arith.constant 0 : index
        %162 = memref.load %arg11[%c0_73] : memref<1xf32, #tpu.memory_space<smem>>
        memref.store %161, %arg11[%c0_73] : memref<1xf32, #tpu.memory_space<smem>>
      } else {
      }
    }
    %c0_23 = arith.constant 0 : index
    %c0_24 = arith.constant 0 : index
    %76 = vector.load %arg8[%c0_23, %c0_24] : memref<2x8xf32, #tpu.memory_space<vmem>>, vector<2x8xf32>
    %c0_25 = arith.constant 0 : index
    %c0_26 = arith.constant 0 : index
    %77 = vector.load %arg9[%c0_25, %c0_26] : memref<2x128xf32, #tpu.memory_space<vmem>>, vector<2x128xf32>
    %c0_27 = arith.constant 0 : index
    %c0_28 = arith.constant 0 : index
    %c0_29 = arith.constant 0 : index
    %78 = vector.load %arg7[%c0_27, %c0_28, %c0_29] : memref<2x8x128xf32, #tpu.memory_space<vmem>>, vector<2x8x128xf32>
    %79 = vector.shape_cast %76 : vector<2x8xf32> to vector<2x8x1xf32>
    %80 = vector.broadcast %79 : vector<2x8x1xf32> to vector<2x8x128xf32>
    %81 = arith.addf %78, %80 : vector<2x8x128xf32>
    %82 = vector.shape_cast %77 : vector<2x128xf32> to vector<2x1x128xf32>
    %83 = vector.broadcast %82 : vector<2x1x128xf32> to vector<2x8x128xf32>
    %84 = arith.addf %81, %83 : vector<2x8x128xf32>
    %85 = math.exp %84 : vector<2x8x128xf32>
    %c0_30 = arith.constant 0 : index
    %c0_31 = arith.constant 0 : index
    %c0_32 = arith.constant 0 : index
    %86 = vector.load %arg4[%c0_30, %c0_31, %c0_32] : memref<2x8x128xf32, #tpu.memory_space<vmem>>, vector<2x8x128xf32>
    tpu.vector_store %arg4[%c0_30, %c0_31, %c0_32], %85 {strides = array<i32>} : memref<2x8x128xf32, #tpu.memory_space<vmem>>, vector<2x8x128xf32>,
    %c0_33 = arith.constant 0 : index
    %c0_34 = arith.constant 0 : index
    %c0_35 = arith.constant 0 : index
    %87 = vector.load %arg6[%c0_33, %c0_34, %c0_35] : memref<2x8x128xf32, #tpu.memory_space<vmem>>, vector<2x8x128xf32>
    %88 = arith.mulf %85, %87 : vector<2x8x128xf32>
    %cst_36 = arith.constant dense<0.000000e+00> : vector<2x8xf32>
    %89 = vector.multi_reduction <add>, %88, %cst_36 [2] : vector<2x8x128xf32> to vector<2x8xf32>
    %cst_37 = arith.constant dense<0.000000e+00> : vector<2xf32>
    %90 = vector.multi_reduction <add>, %89, %cst_37 [1] : vector<2x8xf32> to vector<2xf32>
    %91 = vector.shape_cast %90 : vector<2xf32> to vector<2x1xf32>
    %c0_38 = arith.constant 0 : index
    %c0_39 = arith.constant 0 : index
    %92 = vector.load %arg3[%c0_38, %c0_39] : memref<2x1xf32, #tpu.memory_space<vmem>>, vector<2x1xf32>
    tpu.vector_store %arg3[%c0_38, %c0_39], %91 {strides = array<i32>} : memref<2x1xf32, #tpu.memory_space<vmem>>, vector<2x1xf32>,
    %c0_i32_40 = arith.constant 0 : i32
    %93 = tpu.memref_slice %arg12[%c0_i32_40] : memref<1x!tpu.dma_semaphore, #tpu.memory_space<semaphore_mem>> -> memref<1x!tpu.dma_semaphore, #tpu.memory_space<semaphore_mem>>
    %94 = tpu.memref_squeeze %93 : memref<1x!tpu.dma_semaphore, #tpu.memory_space<semaphore_mem>> -> memref<!tpu.dma_semaphore, #tpu.memory_space<semaphore_mem>>
    tpu.wait_dma2 semaphore(%94 : memref<!tpu.dma_semaphore, #tpu.memory_space<semaphore_mem>>) src(%arg6 : memref<2x8x128xf32, #tpu.memory_space<vmem>>) dst(%arg5 : memref<2x8x128xf32, #tpu.memory_space<any>>)
    return
  }
  func.func @transform_0(%arg0: i32) -> (i32, i32, i32) {
    %c0_i32 = arith.constant 0 : i32
    %c0_i32_0 = arith.constant 0 : i32
    %c0_i32_1 = arith.constant 0 : i32
    %c0_i32_2 = arith.constant 0 : i32
    return %c0_i32, %c0_i32_0, %c0_i32_1 : i32, i32, i32
  }
  func.func @transform_1(%arg0: i32) -> (i32, i32, i32) {
    %c0_i32 = arith.constant 0 : i32
    %c0_i32_0 = arith.constant 0 : i32
    %c0_i32_1 = arith.constant 0 : i32
    %c0_i32_2 = arith.constant 0 : i32
    return %c0_i32, %c0_i32_0, %c0_i32_1 : i32, i32, i32
  }
  func.func @transform_2(%arg0: i32) -> (i32, i32) {
    %c0_i32 = arith.constant 0 : i32
    %c0_i32_0 = arith.constant 0 : i32
    %c0_i32_1 = arith.constant 0 : i32
    return %c0_i32, %c0_i32_0 : i32, i32
  }
  func.func @transform_3(%arg0: i32) -> (i32, i32, i32) {
    %c0_i32 = arith.constant 0 : i32
    %c0_i32_0 = arith.constant 0 : i32
    %c0_i32_1 = arith.constant 0 : i32
    %c0_i32_2 = arith.constant 0 : i32
    return %c0_i32, %c0_i32_0, %c0_i32_1 : i32, i32, i32
  }
}

</mosaic_0001>

<bundles_post_ra>
// kernel: tpu_custom_call.1
= control target key start
LH: loop header
LB: loop body
LE: loop exit
PB: predicated region body
PF: predicated region fallthrough
CT: control target
= control target key end

     0   :  { %10 = vsyncpa [#allocation10], 0  ;;  %s741_s0 = inlined_call_operand.hbm [shape: f32[2,4,8], index: 0, kind: input, shape index: {}]   ;;  %s742_s1 = inlined_call_operand.hbm [shape: f32[2,4,128], index: 1, kind: input, shape index: {}]   ;;  %s743_s2 = inlined_call_operand.vmem [shape: f32[2,1], index: 2, kind: output, shape index: {0}]   ;;  %s744_s3 = inlined_call_operand.hbm [shape: f32[2,8,128], index: 3, kind: output, shape index: {1}]   ;;  %s745_s4 = inlined_call_operand.hbm [shape: f32[2,8,128], index: 4, kind: output, shape index: {2}]  }
   0x1   :  { %11 = vsyncpa [#allocation13], 0 }
   0x2   :  { %12 = vsyncpa [#allocation11], 0  ;;  %s17_s17 = sshll.u32 %s741_s0, 4  ;;  %s628_s18 = smov [#allocation9]   ;;  %s18_s17 = int_to_ptr.hbm [resolvable:$true] %s17_s17 }
   0x3   :  { %s19_s19 = sshll.u32 %s628_s18, 4  ;;  %s30_s22 = sshll.u32 %s742_s1, 4  ;;  %s20_s19 = int_to_ptr.vmem [resolvable:$true] %s19_s19  ;;  %s31_s22 = int_to_ptr.hbm [resolvable:$true] %s30_s22 }
   0x4   :  { %s629_s23 = smov 64   ;;  %s630_s24 = smov 4  }
   0x5   :  { %25 = dma.hbm_to_vmem [thread:$0]  %s18_s17, 128, %s20_s19, [#allocation10], %s629_s23, %s629_s23, %s630_s24  }
   0x6   :  { %s631_s25 = smov [#allocation12]  }
   0x7   :  { %s32_s26 = sshll.u32 %s631_s25, 4  ;;  %s33_s26 = int_to_ptr.vmem [resolvable:$true] %s32_s26 }
   0x8   :  { %38 = dma.hbm_to_vmem [thread:$0]  %s31_s22, 128, %s33_s26, [#allocation13], %s629_s23, %s629_s23, %s630_s24  }
   0x9   :  { %616 = dma.done.wait [#allocation10], 128  }
   0xa   :  { %617 = vsyncadd [#allocation10], 4294967168 }
   0xb   :  { %618 = dma.done.wait [#allocation13], 128  }
   0xc   :  { %619 = vsyncadd [#allocation13], 4294967168  ;;  %vm171_vm0 = vcmask 58368   ;;  %v49_v0 = vlaneseq  ;;  %v632_v1 = vmov 0.0   ;;  %s633_s0 = smov 1e+30  }
   0xd   :  { %172 = vst.msk [vmem:[#allocation4] sm:$0x3] %vm171_vm0, %v632_v1  ;;  %175 = sst [smem:[#allocation7]] %s633_s0  ;;  %v54_v3 = vld [vmem:[#allocation9] sm:$0xf]  ;;  %s634_s1 = smov [#allocation2]  }
   0xe   :  { %173 = vst [vmem:[#allocation5] sm:$0x3] %v632_v1  ;;  %v672_v2 = vshrl.u32 %v49_v0, 7  ;;  %v80_v4 = vperm.slane %v54_v3, 1  ;;  %v58_v5 = vperm.slane %v54_v3, 0  ;;  %v102_v6 = vperm.slane %v54_v3, 2 }
   0xf   :  { %v55_v7 = vld [vmem:[#allocation9 + $0x4] sm:$0xf]  ;;  %v124_v12 = vperm.slane %v54_v3, 3  ;;  %v56_v14 = vld [vmem:[#allocation12] sm:$0xf]  ;;  %v677_v42 = vand.u32 127, %v49_v0 }
  0x10   :  { %485 = vset.pattern.permute.xlu1 %v672_v2  ;;  %484 = vset.pattern.permute.xlu0 %v672_v2  ;;  %v87_v8 = vperm.slane %v55_v7, 1  ;;  %v65_v9 = vperm.slane %v55_v7, 0  ;;  %v109_v10 = vperm.slane %v55_v7, 2  ;;  %v131_v11 = vperm.slane %v55_v7, 3  ;;  %v57_v19 = vld [vmem:[#allocation12 + $0x4] sm:$0xf] }
  0x11   :  { %486 = vset.pattern.permute.xlu2 %v672_v2  ;;  %v94_v17 = vperm.slane %v56_v14, 1  ;;  %v72_v18 = vperm.slane %v56_v14, 0  ;;  %v95_v20 = vperm.slane %v57_v19, 1  ;;  %v73_v21 = vperm.slane %v57_v19, 0  ;;  %s165_s27 = sshll.u32 %s634_s1, 4  ;;  %s167_s30 = sshll.u32 %s745_s4, 4  ;;  %s166_s27 = int_to_ptr.vmem [resolvable:$true] %s165_s27  ;;  %s168_s30 = int_to_ptr.hbm [resolvable:$true] %s167_s30 }
  0x12   :  { %v116_v22 = vperm.slane %v56_v14, 2  ;;  %v117_v27 = vperm.slane %v57_v19, 2  ;;  %v139_v37 = vperm.slane %v57_v19, 3  ;;  %v138_v38 = vperm.slane %v56_v14, 3  ;;  %s691_s4 = smov 0  }
  0x13   :  { %vm52_vm1 = vcmp.lt.s32.totalorder %v677_v42, 16 }
  0x18   :  { %85 = vperm.xlu1 %485, %v80_v4   ;;  %63 = vperm.xlu0 %484, %v58_v5  }
  0x19   :  { %107 = vperm.xlu2 %486, %v102_v6  }
  0x20   :  { %92 = vperm.xlu1 %485, %v87_v8   ;;  %70 = vperm.xlu0 %484, %v65_v9  }
  0x21   :  { %114 = vperm.xlu2 %486, %v109_v10  }
  0x28   :  { %136 = vperm.xlu1 %485, %v131_v11   ;;  %129 = vperm.xlu0 %484, %v124_v12  }
  0x73   :  { %v108_v13 = vpop.permute.xlu2 %107 }
  0x74   :  { %v118_v30 = vsub.f32 %v108_v13, %v116_v22 }
  0x76   :  { %v120_v39 = vmul.f32 %v118_v30, %v118_v30 }
  0x7b   :  { %v115_v31 = vpop.permute.xlu2 %114 }
  0x7c   :  { %v119_v36 = vsub.f32 %v115_v31, %v117_v27 }
  0x7e   :  { %v121_v45 = vmul.f32 %v119_v36, %v119_v36 }
  0x8a   :  { %v86_v15 = vpop.permute.xlu1 %85  ;;  %v64_v16 = vpop.permute.xlu0 %63 }
  0x8b   :  { %v96_v23 = vsub.f32 %v86_v15, %v94_v17  ;;  %v74_v24 = vsub.f32 %v64_v16, %v72_v18 }
  0x8d   :  { %v98_v32 = vmul.f32 %v96_v23, %v96_v23  ;;  %v76_v33 = vmul.f32 %v74_v24, %v74_v24 }
  0x8f   :  { %v100_v40 = vadd.f32 %v98_v32, %v76_v33 }
  0x91   :  { %v122_v50 = vadd.f32 %v120_v39, %v100_v40 }
  0x92   :  { %v93_v25 = vpop.permute.xlu1 %92  ;;  %v71_v26 = vpop.permute.xlu0 %70 }
  0x93   :  { %v97_v28 = vsub.f32 %v93_v25, %v95_v20  ;;  %v75_v29 = vsub.f32 %v71_v26, %v73_v21 }
  0x95   :  { %v99_v34 = vmul.f32 %v97_v28, %v97_v28  ;;  %v77_v35 = vmul.f32 %v75_v29, %v75_v29 }
  0x97   :  { %v101_v41 = vadd.f32 %v99_v34, %v77_v35 }
  0x99   :  { %v123_v48 = vadd.f32 %v121_v45, %v101_v41 }
  0x9a   :  { %v137_v43 = vpop.permute.xlu1 %136  ;;  %v130_v44 = vpop.permute.xlu0 %129 }
  0x9b   :  { %v141_v46 = vsub.f32 %v137_v43, %v139_v37  ;;  %v140_v47 = vsub.f32 %v130_v44, %v138_v38 }
  0x9d   :  { %v143_v49 = vmul.f32 %v141_v46, %v141_v46  ;;  %v142_v51 = vmul.f32 %v140_v47, %v140_v47 }
  0x9f   :  { %v145_v52 = vadd.f32 %v143_v49, %v123_v48  ;;  %v144_v53 = vadd.f32 %v142_v51, %v122_v50 }
  0xa1   :  { %v149_v54 = vsel %vm52_vm1, %v145_v52, 0.0  ;;  %v153_v55 = vmul.f32 -100.0, %v145_v52  ;;  %v148_v56 = vsel %vm52_vm1, %v144_v53, 0.0  ;;  %v152_v57 = vmul.f32 -100.0, %v144_v53 }
  0xa2   :  { %151 = vst [vmem:[#allocation2 + $0x8] sm:$0xff] %v149_v54 }
  0xa3   :  { %v155_v58 = vsel %vm52_vm1, %v153_v55, -1e+30  ;;  %v154_v59 = vsel %vm52_vm1, %v152_v57, -1e+30  ;;  %150 = vst [vmem:[#allocation2] sm:$0xff] %v148_v56 }
  0xa4   :  { %157 = vst [vmem:[#allocation3 + $0x8] sm:$0xff] %v155_v58  ;;  %170 = dma.vmem_to_hbm [thread:$0]  %s166_s27, 256, %s168_s30, [#allocation8] }
  0xa5   :  { %156 = vst [vmem:[#allocation3] sm:$0xff] %v154_v59 }
  0xa6 LB: > { %s182_s5 = sld [smem:[#allocation7]]  ;;  %s626_s4 = sphi %s691_s4, %s181_s4  }
  0xac   : > { %p183_p0 = scmp.ge.f32.partialorder %s182_s5, 0.1 }
  0xad   : > { %487 = vset.pattern.permute.xlu0 (%p183_p0), %v672_v2  ;;  %488 = vset.pattern.permute.xlu1 (%p183_p0), %v672_v2  ;;  %v698_v60 = vld [vmem:[#allocation4] sm:$0x3] (%p183_p0)  ;;  %v702_v63 = vld [vmem:[#allocation5] sm:$0x3] (%p183_p0)  ;;  %v190_v0 = vld [vmem:[#allocation3] sm:$0xff] (%p183_p0)  ;;  %v635_v20 = vmov (%p183_p0), 0  }
  0xae   : > { %186 = sbr.rel (!%p183_p0) target bundleno = 882 (0x372), region = 32  ;;  %v192_v61 = vperm.slane (%p183_p0), %v698_v60, 0  ;;  %v199_v62 = vperm.slane (%p183_p0), %v698_v60, 1  ;;  %v210_v1 = vperm.slane (%p183_p0), %v702_v63, 0  ;;  %v209_v6 = vrot.slane (%p183_p0), %v702_v63, 1  ;;  %v191_v7 = vld [vmem:[#allocation3 + $0x8] sm:$0xff] (%p183_p0)  ;;  %489 = vset.pattern.permute.xlu2 (%p183_p0), %v635_v20 }
  0xaf   : > { %vm269_vm2 = vcmask (%p183_p0), 1041409   ;;  %vm187_vm3 = vcmp.lt.s32.totalorder (%p183_p0), %v677_v42, 8  ;;  %v636_v54 = vmov (%p183_p0), 2.0   ;;  %vm346_vm4 = vcmask (%p183_p0), 1041408  }
  0xb0   : > { %v211_v8 = vperm.slane (%p183_p0), %v209_v6, 0  ;;  %vm363_vm6 = vcmask (%p183_p0), 0  }
  0xb5   : > { %197 = vperm.xlu0 %487, %v192_v61  }
  0xbd   : > { %204 = vperm.xlu0 %487, %v199_v62  }
  0xc5   : > { %244 = vperm.xlu0 %487, %v192_v61  }
  0xcd   : > { %490 = vset.pattern.permute.xlu0 %v635_v20 }
 0x127   : > { %v198_v3 = vpop.permute.xlu0 %197 }
 0x128   : > { %v206_v4 = vadd.f32 %v198_v3, %v190_v0 }
 0x12a   : > { %v705_v5 = vadd.f32 %v210_v1, %v206_v4 }
 0x12c   : > { %216 = vmax.xlane.f32.xlu1 %v705_v5 }
 0x12f   : > { %v205_v9 = vpop.permute.xlu0 %204 }
 0x130   : > { %v207_v10 = vadd.f32 %v205_v9, %v191_v7 }
 0x132   : > { %v215_v11 = vadd.f32 %v211_v8, %v207_v10 }
 0x134   : > { %218 = vmax.xlane.f32.xlu1 %v215_v11 }
 0x137   : > { %v245_v27 = vpop.permute.xlu0 %244 }
 0x14d   : > { %251 = vperm.xlu1 %488, %v199_v62  }
 0x19f   : > { %v217_v12 = vpop.xlane.xlu1 %216 }
 0x1a0   : > { %v220_v13 = vsub.f32 %v705_v5, %v217_v12 }
 0x1a2   : > { %v222_v14 = vmul.f32 1.442695, %v220_v13 }
 0x1a4   : > { %493 = vpow2.f32 %v222_v14 }
 0x1a7   : > { %v219_v15 = vpop.xlane.xlu1 %218 }
 0x1a8   : > { %v221_v16 = vsub.f32 %v215_v11, %v219_v15 }
 0x1aa   : > { %v494_v17 = vpop.eup %493  ;;  %v224_v18 = vmul.f32 1.442695, %v221_v16 }
 0x1ab   : > { %226 = vadd.xlane.f32.xlu2 %v494_v17 }
 0x1ac   : > { %495 = vpow2.f32 %v224_v18 }
 0x1b2   : > { %v496_v19 = vpop.eup %495 }
 0x1b3   : > { %228 = vadd.xlane.f32.xlu2 %v496_v19 }
 0x1bf   : > { %v252_v32 = vpop.permute.xlu1 %251 }
 0x21e   : > { %v227_v21 = vpop.xlane.xlu2 %226 }
 0x21f   : > { %497 = vlog2.f32 %v227_v21 }
 0x225   : > { %v498_v22 = vpop.eup %497 }
 0x226   : > { %v231_v23 = vmul.f32 0.6931472, %v498_v22  ;;  %v229_v24 = vpop.xlane.xlu2 %228 }
 0x227   : > { %499 = vlog2.f32 %v229_v24 }
 0x228   : > { %v234_v25 = vadd.f32 %v231_v23, %v217_v12  ;;  %501 = vrcp.f32 %v636_v54 }
 0x22a   : > { %v236_v26 = vsub.f32 -2.0794415, %v234_v25 }
 0x22c   : > { %v255_v28 = vadd.f32 %v245_v27, %v236_v26 }
 0x22d   : > { %v500_v29 = vpop.eup %499 }
 0x22e   : > { %v233_v30 = vmul.f32 0.6931472, %v500_v29  ;;  %262 = vperm.xlu2 %489, %v255_v28   ;;  %v502_v58 = vpop.eup %501 }
 0x22f   : > { %v355_v59 = vmul.f32 2.0, %v502_v58  ;;  %vm359_vm5 = vweird.f32 %v502_v58 }
 0x230   : > { %v235_v31 = vadd.f32 %v233_v30, %v219_v15 }
 0x231   : > { %v356_v0 = vsub.f32 1.0, %v355_v59 }
 0x232   : > { %v237_v33 = vsub.f32 -2.0794415, %v235_v31 }
 0x233   : > { %v357_v10 = vmul.f32 %v502_v58, %v356_v0 }
 0x234   : > { %v256_v34 = vadd.f32 %v252_v32, %v237_v33 }
 0x235   : > { %v358_v16 = vadd.f32 %v502_v58, %v357_v10 }
 0x236   : > { %265 = vperm.xlu0 %490, %v256_v34   ;;  %491 = vset.pattern.permute.xlu2 %v672_v2 }
 0x237   : > { %v360_v21 = vsel %vm359_vm5, %v502_v58, %v358_v16 }
 0x23e   : > { %492 = vset.pattern.permute.xlu0 %v672_v2 }
 0x288   : > { %v263_v35 = vpop.permute.xlu2 %262 }
 0x289   : > { %v267_v37 = vperm.slane %v263_v35, %v677_v42 }
 0x2a8   : > { %v266_v36 = vpop.permute.xlu0 %265 }
 0x2a9   : > { %v268_v38 = vperm.slane %v266_v36, %v677_v42 }
 0x2ab   : > { %v270_v39 = vsel %vm269_vm2, %v268_v38, %v267_v37 }
 0x2ac   : > { %v272_v40 = vsel %vm187_vm3, %v270_v39, 0.0 }
 0x2ad   : > { %v273_v41 = vsub.f32 %v272_v40, %v698_v60  ;;  %340 = vst.msk [vmem:[#allocation4] sm:$0x3] %vm171_vm0, %v272_v40 }
 0x2af   : > { %v281_v43 = vperm.slane %v273_v41, 1  ;;  %v274_v44 = vperm.slane %v273_v41, 0  ;;  %v342_v45 = vand.u32 2147483647, %v273_v41 }
 0x2b1   : > { %286 = vperm.xlu2 %491, %v281_v43   ;;  %279 = vperm.xlu1 %488, %v274_v44   ;;  %v343_v46 = vsel %vm171_vm0, %v342_v45, 0.0 }
 0x2b2   : > { %344 = vadd.xlane.f32.xlu0 %v343_v46 }
 0x30b   : > { %v287_v47 = vpop.permute.xlu2 %286 }
 0x30c   : > { %v289_v48 = vadd.f32 %v287_v47, %v215_v11 }
 0x30e   : > { %v296_v49 = vrot.slane %v289_v48, 4 }
 0x310   : > { %v297_v50 = vmax.f32 %v289_v48, %v296_v49 }
 0x312   : > { %v298_v51 = vrot.slane %v297_v50, 2 }
 0x314   : > { %v299_v52 = vmax.f32 %v297_v50, %v298_v51 }
 0x316   : > { %v300_v53 = vrot.slane %v299_v52, 1 }
 0x318   : > { %v301_v55 = vmax.f32 %v299_v52, %v300_v53 }
 0x31a   : > { %v303_v56 = vsub.f32 %v289_v48, %v301_v55 }
 0x31c   : > { %v306_v57 = vmul.f32 1.442695, %v303_v56 }
 0x31e   : > { %503 = vpow2.f32 %v306_v57 }
 0x323   : > { %v280_v60 = vpop.permute.xlu1 %279 }
 0x324   : > { %v504_v61 = vpop.eup %503  ;;  %v288_v62 = vadd.f32 %v280_v60, %v705_v5 }
 0x325   : > { %v314_v1 = vrot.slane %v504_v61, 4  ;;  %v345_v3 = vpop.xlane.xlu0 %344 }
 0x326   : > { %v290_v4 = vrot.slane %v288_v62, 4  ;;  %v347_v7 = vsel %vm346_vm4, %v345_v3, 0.0 }
 0x327   : > { %v348_v8 = vrot.slane %v347_v7, 4  ;;  %v315_v11 = vadd.f32 %v504_v61, %v314_v1 }
 0x328   : > { %v291_v9 = vmax.f32 %v288_v62, %v290_v4 }
 0x329   : > { %v349_v12 = vadd.f32 %v348_v8, %v347_v7  ;;  %v316_v17 = vrot.slane %v315_v11, 2 }
 0x32a   : > { %v292_v13 = vrot.slane %v291_v9, 2 }
 0x32b   : > { %v350_v14 = vrot.slane %v349_v12, 2  ;;  %v317_v22 = vadd.f32 %v316_v17, %v315_v11 }
 0x32c   : > { %v293_v15 = vmax.f32 %v291_v9, %v292_v13 }
 0x32d   : > { %v351_v18 = vadd.f32 %v350_v14, %v349_v12  ;;  %v318_v27 = vrot.slane %v317_v22, 1 }
 0x32e   : > { %v294_v19 = vrot.slane %v293_v15, 1 }
 0x32f   : > { %v352_v20 = vrot.slane %v351_v18, 1  ;;  %v319_v29 = vadd.f32 %v318_v27, %v317_v22 }
 0x330   : > { %v295_v5 = vmax.f32 %v293_v15, %v294_v19 }
 0x331   : > { %v353_v23 = vadd.f32 %v352_v20, %v351_v18 }
 0x332   : > { %v302_v24 = vsub.f32 %v288_v62, %v295_v5 }
 0x333   : > { %v361_v25 = vmul.f32 %v360_v21, %v353_v23 }
 0x334   : > { %v304_v26 = vmul.f32 1.442695, %v302_v24 }
 0x335   : > { %v362_v28 = vmul.f32 0.01, %v361_v25 }
 0x336   : > { %505 = vpow2.f32 %v304_v26 }
 0x337   : > { %364 = vst.msk [vmem:[#allocation6] sm:$0x1] %vm363_vm6, %v362_v28  ;;  %507 = vlog2.f32 %v319_v29 }
 0x33c   : > { %v506_v30 = vpop.eup %505 }
 0x33d   : > { %v308_v31 = vrot.slane %v506_v30, 4  ;;  %v508_v35 = vpop.eup %507 }
 0x33e   : > { %v365_v32 = vld [vmem:[#allocation6] sm:$0x1]  ;;  %v323_v38 = vmul.f32 0.6931472, %v508_v35 }
 0x33f   : > { %v309_v33 = vadd.f32 %v506_v30, %v308_v31  ;;  %462 = vpush %v365_v32 }
 0x340   : > { %v325_v40 = vadd.f32 %v323_v38, %v301_v55 }
 0x341   : > { %v310_v34 = vrot.slane %v309_v33, 2 }
 0x342   : > { %v327_v41 = vsub.f32 -2.7725885, %v325_v40 }
 0x343   : > { %v311_v36 = vadd.f32 %v310_v34, %v309_v33 }
 0x344   : > { %v331_v45 = vadd.f32 %v327_v41, %v209_v6 }
 0x345   : > { %v312_v37 = vrot.slane %v311_v36, 1 }
 0x346   : > { %v336_v48 = vrot.slane %v331_v45, 7 }
 0x347   : > { %v313_v39 = vadd.f32 %v312_v37, %v311_v36 }
 0x349   : > { %509 = vlog2.f32 %v313_v39 }
 0x34f   : > { %v510_v43 = vpop.eup %509 }
 0x350   : > { %v321_v44 = vmul.f32 0.6931472, %v510_v43 }
 0x352   : > { %v324_v46 = vadd.f32 %v321_v44, %v295_v5 }
 0x354   : > { %v326_v47 = vsub.f32 -2.7725885, %v324_v46 }
 0x356   : > { %v330_v49 = vadd.f32 %v326_v47, %v702_v63 }
 0x358   : > { %v337_v50 = vsel %vm269_vm2, %v336_v48, %v330_v49 }
 0x359   : > { %v339_v51 = vsel %vm52_vm1, %v337_v50, 0.0 }
 0x35a   : > { %341 = vst [vmem:[#allocation5] sm:$0x3] %v339_v51 }
 0x370   : > { %s463_s6 = spop %462 }
 0x371   : > { %367 = sst [smem:[#allocation7]] %s463_s6 }
 0x372 PF: > { %s181_s4 = sadd.s32 1, %s626_s4  }
 0x373   : > { %p178_p1 = scmp.ge.s32.totalorder %s181_s4, 100  }
 0x374   :  { %511 = vset.pattern.permute.xlu0 (%p178_p1), %v672_v2  ;;  %v368_v6 = vld [vmem:[#allocation4] sm:$0x3] (%p178_p1)  ;;  %v369_v53 = vld [vmem:[#allocation5] sm:$0x3] (%p178_p1)  ;;  %v370_v54 = vld [vmem:[#allocation3] sm:$0xff] (%p178_p1)  ;;  %vm414_vm7 = vcmask (%p178_p1), 1041409  }
 0x375   :  { %180 = sbr.rel (!%p178_p1) target bundleno = 166 (0xa6), region = 60  ;;  %v372_v52 = vperm.slane (%p178_p1), %v368_v6, 0  ;;  %v379_v63 = vperm.slane (%p178_p1), %v368_v6, 1  ;;  %v390_v55 = vperm.slane (%p178_p1), %v369_v53, 0  ;;  %v389_v59 = vrot.slane (%p178_p1), %v369_v53, 1  ;;  %v371_v61 = vld [vmem:[#allocation3 + $0x8] sm:$0xff] (%p178_p1) }
 0x376   :  { %v402_v2 = vld [vmem:[#allocation2] sm:$0xff] (%p178_p1)  ;;  %v403_v9 = vld [vmem:[#allocation2 + $0x8] sm:$0xff] (%p178_p1)  ;;  %vm420_vm8 = vcmask (%p178_p1), 1024  }
 0x377   :  { %v391_v62 = vperm.slane (%p178_p1), %v389_v59, 0 }
 0x37c   :  { %377 = vperm.xlu0 %511, %v372_v52  }
 0x384   :  { %384 = vperm.xlu0 %511, %v379_v63  }
 0x3ee   :  { %v378_v56 = vpop.permute.xlu0 %377 }
 0x3ef   :  { %v386_v57 = vadd.f32 %v378_v56, %v370_v54 }
 0x3f1   :  { %v394_v58 = vadd.f32 %v390_v55, %v386_v57 }
 0x3f3   :  { %v396_v60 = vmul.f32 1.442695, %v394_v58 }
 0x3f5   :  { %512 = vpow2.f32 %v396_v60 }
 0x3f6   :  { %v385_v0 = vpop.permute.xlu0 %384 }
 0x3f7   :  { %v387_v1 = vadd.f32 %v385_v0, %v371_v61 }
 0x3f9   :  { %v395_v3 = vadd.f32 %v391_v62, %v387_v1 }
 0x3fb   :  { %v513_v4 = vpop.eup %512  ;;  %v398_v7 = vmul.f32 1.442695, %v395_v3 }
 0x3fc   :  { %400 = vst [vmem:[#allocation14] sm:$0xff] %v513_v4  ;;  %v404_v8 = vmul.f32 %v513_v4, %v402_v2 }
 0x3fd   :  { %514 = vpow2.f32 %v398_v7 }
 0x3fe   :  { %406 = vadd.xlane.f32.xlu1 %v404_v8 }
 0x403   :  { %v515_v10 = vpop.eup %514 }
 0x404   :  { %401 = vst [vmem:[#allocation14 + $0x8] sm:$0xff] %v515_v10  ;;  %v405_v11 = vmul.f32 %v515_v10, %v403_v9 }
 0x406   :  { %408 = vadd.xlane.f32.xlu1 %v405_v11 }
 0x471   :  { %v407_v12 = vpop.xlane.xlu1 %406 }
 0x472   :  { %v412_v14 = vperm.slane %v407_v12, %v677_v42 }
 0x479   :  { %v409_v13 = vpop.xlane.xlu1 %408 }
 0x47a   :  { %v413_v15 = vperm.slane %v409_v13, %v677_v42 }
 0x47c   :  { %v415_v16 = vsel %vm414_vm7, %v413_v15, %v412_v14 }
 0x47d   :  { %v417_v17 = vsel %vm171_vm0, %v415_v16, 0.0 }
 0x47e   :  { %418 = vadd.xlane.f32.xlu2 %v417_v17 }
 0x4f1   :  { %v419_v18 = vpop.xlane.xlu2 %418 }
 0x4f2   :  { %421 = vst.msk [vmem:[%s743_s2] sm:$0x3] %vm420_vm8, %v419_v18 }
 0x4f3   :  { %620 = dma.done.wait [#allocation8], 256 }
 0x4f4   :  { %621 = vsyncadd [#allocation8], 4294967040  ;;  %s434_s11 = sshll.u32 %s744_s3, 4  ;;  %s637_s12 = smov [#allocation14]   ;;  %s435_s11 = int_to_ptr.hbm [resolvable:$true] %s434_s11 }
 0x4f5   :  { %s432_s13 = sshll.u32 %s637_s12, 4  ;;  %s638_s14 = smov 128   ;;  %s433_s13 = int_to_ptr.vmem [resolvable:$true] %s432_s13 }
 0x4f6   :  { %s639_s15 = smov 8  }
 0x4f7   :  { %440 = dma.vmem_to_hbm [thread:$0]  %s433_s13, 256, %s435_s11, [#allocation11], %s638_s14, %s638_s14, %s639_s15  }
 0x4f8   :  { %622 = dma.done.wait [#allocation11], 256  }
 0x4f9   :  { %623 = vsyncadd [#allocation11], 4294967040 }
 0x4fa   :  { %447 = vsyncpa [#allocation10], 1 }
 0x4fb   :  { %448 = vsyncpa [#allocation13], 1 }
 0x4fc   :  { %449 = vsyncpa [#allocation11], 1 }
 0x4fd   :  { %450 = vsyncmov [#allocation8] }
 0x500   :  { %s451_s2 = vpop.sfrf %450 }
 0x501   :  { %p461_p2 = scmp.ne.s32.totalorder %s451_s2, 0 }
 0x503   :  { %455 = shalt.err (%p461_p2)  }

</bundles_post_ra>
